<compile_context>
chip_gen: v7x
topology: tpu7x:2x2x1
jax: 0.10.0
libtpu: 0.0.40
codegen_flags: <defaults>
</compile_context>

<pallas_src>
import jax
import jax.numpy as jnp
from jax import lax
from jax.experimental import pallas as pl
from jax.experimental.pallas import tpu as pltpu


# --------------------------------- kernel ----------------------------------

def _recip(d):
    """Reciprocal via EUP approx + one Newton step (~1e-7 relative error)."""
    r = pl.reciprocal(d, approx=True)
    return r * (2.0 - d * r)


def _make_kernel(h_orig, w_orig, needs_mask):
    """Build the SurfaceNet kernel for a (possibly padded) [TB,H,W] block."""

    def kernel(x_ref, ax_ref, ay_ref, sn_ref, curv_ref):
        x = x_ref[...]          # [TB, H, W]   (padded spatial dims)
        ax = ax_ref[...]        # [TB or 1, H, W]
        ay = ay_ref[...]

        hh, ww = x.shape[-2], x.shape[-1]
        lane_ax, subl_ax = x.ndim - 1, x.ndim - 2

        # ---- hoisted boundary masks (built once, reused at all call sites) ----
        col = lax.broadcasted_iota(jnp.int32, (1, hh, ww), 2)
        row = lax.broadcasted_iota(jnp.int32, (1, hh, ww), 1)
        m_col_lt = (col < ww - 1).astype(jnp.float32)   # shift_w(+1) validity
        m_col_gt = (col > 0).astype(jnp.float32)        # shift_w(-1) validity
        m_row_lt = (row < hh - 1).astype(jnp.float32)   # shift_h(+1) validity
        m_row_gt = (row > 0).astype(jnp.float32)        # shift_h(-1) validity
        if needs_mask:
            # positions inside the ORIGINAL (unpadded) image
            valid = ((col < w_orig) & (row < h_orig)).astype(jnp.float32)

        # shifts via XLU roll + one 0/1 multiply (no slice/concat retiling)
        def sw_p(a):   # result[..., j] = a[..., j+1], zero outside
            return pltpu.roll(a, shift=(ww - 1) % ww, axis=lane_ax) * m_col_lt

        def sw_m(a):   # result[..., j] = a[..., j-1], zero outside
            return pltpu.roll(a, shift=1, axis=lane_ax) * m_col_gt

        def sh_p(a):   # result[..., i, :] = a[..., i+1, :], zero outside
            return pltpu.roll(a, shift=(hh - 1) % hh, axis=subl_ax) * m_row_lt

        def sh_m(a):   # result[..., i, :] = a[..., i-1, :], zero outside
            return pltpu.roll(a, shift=1, axis=subl_ax) * m_row_gt

        def conv_dx(a):   # cross-corr with [[0,0,0],[-1,0,1],[0,0,0]], pad 1
            return sw_p(a) - sw_m(a)

        def conv_dy(a):   # cross-corr with [[0,-1,0],[0,0,0],[0,1,0]], pad 1
            return sh_p(a) - sh_m(a)

        # ---- fused reciprocal: 1/(x/a + 1e-6) == a / (x + 1e-6*a) ----
        inv_dx = ax * _recip(x + 1e-6 * ax)
        inv_dy = ay * _recip(x + 1e-6 * ay)

        # n = (-dz/dx, -dz/dy, 1); the minus sign folded into the 0.5 scale.
        nx = conv_dx(x) * (-0.5) * inv_dx
        ny = conv_dy(x) * (-0.5) * inv_dy

        # Normalize with a single rsqrt (+ one Newton step); snz is just inv.
        t = nx * nx + ny * ny + 1.0
        inv = lax.rsqrt(t)
        inv = inv * (1.5 - 0.5 * t * inv * inv)
        sn_ref[:, 2, :, :] = inv               # store snz eagerly
        snx = nx * inv
        sny = ny * inv
        if needs_mask:
            # outside the original image sn must act as zero for the next conv
            snx = snx * valid
            sny = sny * valid
        sn_ref[:, 0, :, :] = snx
        sn_ref[:, 1, :, :] = sny

        # mean curvature = (conv_dx(snx)/2 + conv_dy(sny)/2) / 2
        mean_cur = (conv_dx(snx) + conv_dy(sny)) * 0.25
        if needs_mask:
            mean_cur = mean_cur * valid        # avg_pool zero-pads outside image

        # 3x3 avg-pool (stride 1, zero pad, count_include_pad) done separably.
        row_sum = sw_m(mean_cur) + mean_cur + sw_p(mean_cur)
        pooled = sh_m(row_sum) + row_sum + sh_p(row_sum)
        curv_ref[...] = jnp.abs(pooled * (1.0 / 9.0))

    return kernel


# -------------------------------- wrapper -----------------------------------

def _round_up(n, m):
    return (n + m - 1) // m * m


def _vmem_capacity_bytes():
    try:
        return int(pltpu.get_tpu_info().vmem_capacity_bytes)
    except Exception:
        return 64 << 20   # conservative fallback (v7x per-core VMEM)


def _pick_batch_tile(b, h_pad, w_pad, planes_per_elem=28):
    """Generation-aware batch packing + explicit VMEM limit.

    ~28 f32 planes per element: 7 HBM planes (3 in + 4 out) double-buffered
    (=14) plus ~12-14 live full-plane temporaries inside the kernel.
    """
    cap = _vmem_capacity_bytes()
    budget = int(cap * 0.40)                       # headroom for compiler scratch
    per_elem = h_pad * w_pad * 4 * planes_per_elem
    tb = max(1, min(b, budget // max(per_elem, 1)))
    # keep >= ~4 grid steps (when b allows) so double-buffering overlaps DMA
    tb = min(tb, max(1, b // 4))
    while b % tb:
        tb -= 1
    needed = tb * per_elem
    vmem_limit = min(max(needed, 32 << 20), int(cap * 0.90))
    # TODO(synk): if a single [H,W] plane set exceeds the budget even at tb=1
    # (earliest on v7x's 64 MiB VMEM), add a second grid axis over H strips
    # with an 8-row halo (halo rows via extra thin BlockSpecs) so VMEM stays
    # bounded and both v7x TensorCores get work.
    return tb, vmem_limit


def surface_net(x, ax, ay):
    """x: [B,1,H,W]; ax, ay: same shape or batch-shared [1,1,H,W].

    Returns (surface_norm [B,3,H,W] f32, curvature [B,H,W] f32)."""
    b, c, h, w = x.shape
    assert c == 1, "SurfaceNet expects a single depth channel"
    xs = x[:, 0].astype(jnp.float32)

    def prep(a):
        a = jnp.asarray(a, jnp.float32)
        if a.shape == x.shape:
            return a[:, 0], False
        if a.ndim == 4 and a.shape[0] == 1 and a.shape[1] == 1 and a.shape[2:] == (h, w):
            return a[:, 0], True          # batch-shared plane, no broadcast in HBM
        # TODO(synk): other broadcastable shapes (per-image scalars / vectors)
        # could go through SMEM scalar prefetch instead of a full-plane broadcast.
        return jnp.broadcast_to(a, x.shape)[:, 0], False

    axs, ax_shared = prep(ax)
    ays, ay_shared = prep(ay)

    # Pad to lane/sublane-aligned spatial dims so all stores are full-lane.
    h_pad = _round_up(h, 8)
    w_pad = _round_up(w, 128)
    needs_mask = (h_pad != h) or (w_pad != w)
    if needs_mask:
        def pad3(a, cval):
            return jnp.pad(a, ((0, 0), (0, h_pad - h), (0, w_pad - w)),
                           constant_values=cval)
        xs = pad3(xs, 0.0)          # depth padded with 0 (matches conv zero pad)
        axs = pad3(axs, 1.0)        # scales padded with 1 (keeps divisions finite)
        ays = pad3(ays, 1.0)

    tb, vmem_limit = _pick_batch_tile(b, h_pad, w_pad)

    def in_spec(shared):
        if shared:
            return pl.BlockSpec((1, h_pad, w_pad), lambda i: (0, 0, 0))
        return pl.BlockSpec((tb, h_pad, w_pad), lambda i: (i, 0, 0))

    sn, curv = pl.pallas_call(
        _make_kernel(h, w, needs_mask),
        out_shape=(
            jax.ShapeDtypeStruct((b, 3, h_pad, w_pad), jnp.float32),
            jax.ShapeDtypeStruct((b, h_pad, w_pad), jnp.float32),
        ),
        grid=(b // tb,),
        in_specs=[in_spec(False), in_spec(ax_shared), in_spec(ay_shared)],
        out_specs=(
            pl.BlockSpec((tb, 3, h_pad, w_pad), lambda i: (i, 0, 0, 0)),
            pl.BlockSpec((tb, h_pad, w_pad), lambda i: (i, 0, 0)),
        ),
        compiler_params=pltpu.CompilerParams(
            dimension_semantics=("parallel",),
            vmem_limit_bytes=vmem_limit),
    )(xs, axs, ays)

    if needs_mask:
        sn = sn[:, :, :h, :w]
        curv = curv[:, :h, :w]
    return sn, curv


# ------------------------------- reference ----------------------------------

def _ref_forward(x, ax, ay):
    """Plain-JAX (XLA) reference mirroring the torch forward, for checking."""
    kx = jnp.array([[0., 0., 0.], [-1., 0., 1.], [0., 0., 0.]], jnp.float32).reshape(1, 1, 3, 3)
    ky = jnp.array([[0., -1., 0.], [0., 0., 0.], [0., 1., 0.]], jnp.float32).reshape(1, 1, 3, 3)

    def conv(a, k):
        return lax.conv_general_dilated(
            a, k, (1, 1), ((1, 1), (1, 1)),
            dimension_numbers=("NCHW", "OIHW", "NCHW"))

    delta_x = x / ax + 1e-6
    delta_y = x / ay + 1e-6
    dzdx = conv(x, kx) / 2.0 / delta_x
    dzdy = conv(x, ky) / 2.0 / delta_y
    dzdz = jnp.ones_like(dzdy)
    sn = jnp.stack((-dzdx, -dzdy, dzdz), 2)                         # [B,1,3,H,W]
    sn = sn / jnp.linalg.norm(sn, axis=2)[:, :, None, :, :]
    cur_x = conv(sn[:, :, 0, :, :], kx) / 2.0
    cur_y = conv(sn[:, :, 1, :, :], ky) / 2.0
    mean_cur = (cur_x + cur_y) / 2.0                                # [B,1,H,W]
    mc = mean_cur[:, 0]                                             # [B,H,W]
    pooled = lax.reduce_window(
        mc, 0.0, lax.add, (1, 3, 3), (1, 1, 1),
        [(0, 0), (1, 1), (1, 1)]) / 9.0
    return sn[:, 0], jnp.abs(pooled)


if __name__ == "__main__":
    key = jax.random.PRNGKey(0)
    k1, k2, k3, k4, k5, k6 = jax.random.split(key, 6)

    # Test 1: lane/sublane-aligned spatial dims, full-shape ax/ay.
    B, C, H, W = 2, 1, 16, 128
    x = jax.random.uniform(k1, (B, C, H, W), jnp.float32, 0.5, 1.5)
    ax = jax.random.uniform(k2, (B, C, H, W), jnp.float32, 0.5, 1.5)
    ay = jax.random.uniform(k3, (B, C, H, W), jnp.float32, 0.5, 1.5)
    sn, curv = surface_net(x, ax, ay)
    jax.block_until_ready((sn, curv))
    sn_ref, curv_ref = _ref_forward(x, ax, ay)
    assert sn.shape == (B, 3, H, W) and curv.shape == (B, H, W)
    assert jnp.allclose(sn, sn_ref, rtol=1e-5, atol=1e-5)
    assert jnp.allclose(curv, curv_ref, rtol=1e-5, atol=1e-5)

    # Test 2: unaligned spatial dims (pad/crop + validity-mask path) and
    # batch-shared ax/ay planes (no HBM broadcast materialization).
    B2, H2, W2 = 2, 13, 100
    x2 = jax.random.uniform(k4, (B2, 1, H2, W2), jnp.float32, 0.5, 1.5)
    ax2 = jax.random.uniform(k5, (1, 1, H2, W2), jnp.float32, 0.5, 1.5)
    ay2 = jax.random.uniform(k6, (1, 1, H2, W2), jnp.float32, 0.5, 1.5)
    sn2, curv2 = surface_net(x2, ax2, ay2)
    jax.block_until_ready((sn2, curv2))
    sn2_ref, curv2_ref = _ref_forward(x2, ax2, ay2)
    assert sn2.shape == (B2, 3, H2, W2) and curv2.shape == (B2, H2, W2)
    assert jnp.allclose(sn2, sn2_ref, rtol=1e-5, atol=1e-5)
    assert jnp.allclose(curv2, curv2_ref, rtol=1e-5, atol=1e-5)

    print("KERNEL_OK")
</pallas_src>

<mosaic_0001>
module attributes {stable_mosaic.version = 11 : i64} {
  func.func @kernel(%arg0: i32, %arg1: memref<1x16x128xf32, #tpu.memory_space<vmem>>, %arg2: memref<1x16x128xf32, #tpu.memory_space<vmem>>, %arg3: memref<1x16x128xf32, #tpu.memory_space<vmem>>, %arg4: memref<1x3x16x128xf32, #tpu.memory_space<vmem>>, %arg5: memref<1x16x128xf32, #tpu.memory_space<vmem>>) attributes {dimension_semantics = [#tpu.dimension_semantics<parallel>], iteration_bounds = array<i64: 2>, scalar_prefetch = 0 : i64, scratch_operands = 0 : i64, tpu.core_type = #tpu.core_type<tc>, window_params = [{transform_indices = @transform_0, window_bounds = array<i64: 1, 16, 128>}, {transform_indices = @transform_1, window_bounds = array<i64: 1, 16, 128>}, {transform_indices = @transform_2, window_bounds = array<i64: 1, 16, 128>}, {transform_indices = @transform_3, window_bounds = array<i64: 1, 3, 16, 128>}, {transform_indices = @transform_4, window_bounds = array<i64: 1, 16, 128>}]} {
    %c0 = arith.constant 0 : index
    %c0_0 = arith.constant 0 : index
    %c0_1 = arith.constant 0 : index
    %0 = vector.load %arg1[%c0, %c0_0, %c0_1] : memref<1x16x128xf32, #tpu.memory_space<vmem>>, vector<1x16x128xf32>
    %c0_2 = arith.constant 0 : index
    %c0_3 = arith.constant 0 : index
    %c0_4 = arith.constant 0 : index
    %1 = vector.load %arg2[%c0_2, %c0_3, %c0_4] : memref<1x16x128xf32, #tpu.memory_space<vmem>>, vector<1x16x128xf32>
    %c0_5 = arith.constant 0 : index
    %c0_6 = arith.constant 0 : index
    %c0_7 = arith.constant 0 : index
    %2 = vector.load %arg3[%c0_5, %c0_6, %c0_7] : memref<1x16x128xf32, #tpu.memory_space<vmem>>, vector<1x16x128xf32>
    %3 = tpu.iota {dimensions = array<i32: 2>} : vector<1x16x128xi32>
    %4 = tpu.iota {dimensions = array<i32: 1>} : vector<1x16x128xi32>
    %c127_i32 = arith.constant 127 : i32
    %5 = vector.broadcast %c127_i32 : i32 to vector<1x16x128xi32>
    %6 = arith.cmpi slt, %3, %5 : vector<1x16x128xi32>
    %7 = arith.extui %6 : vector<1x16x128xi1> to vector<1x16x128xi32>
    %8 = arith.sitofp %7 : vector<1x16x128xi32> to vector<1x16x128xf32>
    %c0_i32 = arith.constant 0 : i32
    %9 = vector.broadcast %c0_i32 : i32 to vector<1x16x128xi32>
    %10 = arith.cmpi sgt, %3, %9 : vector<1x16x128xi32>
    %11 = arith.extui %10 : vector<1x16x128xi1> to vector<1x16x128xi32>
    %12 = arith.sitofp %11 : vector<1x16x128xi32> to vector<1x16x128xf32>
    %c15_i32 = arith.constant 15 : i32
    %13 = vector.broadcast %c15_i32 : i32 to vector<1x16x128xi32>
    %14 = arith.cmpi slt, %4, %13 : vector<1x16x128xi32>
    %15 = arith.extui %14 : vector<1x16x128xi1> to vector<1x16x128xi32>
    %16 = arith.sitofp %15 : vector<1x16x128xi32> to vector<1x16x128xf32>
    %c0_i32_8 = arith.constant 0 : i32
    %17 = vector.broadcast %c0_i32_8 : i32 to vector<1x16x128xi32>
    %18 = arith.cmpi sgt, %4, %17 : vector<1x16x128xi32>
    %19 = arith.extui %18 : vector<1x16x128xi1> to vector<1x16x128xi32>
    %20 = arith.sitofp %19 : vector<1x16x128xi32> to vector<1x16x128xf32>
    %cst = arith.constant 9.99999997E-7 : f32
    %21 = vector.broadcast %cst : f32 to vector<1x16x128xf32>
    %22 = arith.mulf %21, %1 : vector<1x16x128xf32>
    %23 = arith.addf %0, %22 : vector<1x16x128xf32>
    %24 = tpu.reciprocal %23 {approx = true} : vector<1x16x128xf32> -> vector<1x16x128xf32>
    %25 = arith.mulf %23, %24 : vector<1x16x128xf32>
    %cst_9 = arith.constant 2.000000e+00 : f32
    %26 = vector.broadcast %cst_9 : f32 to vector<1x16x128xf32>
    %27 = arith.subf %26, %25 : vector<1x16x128xf32>
    %28 = arith.mulf %24, %27 : vector<1x16x128xf32>
    %29 = arith.mulf %1, %28 : vector<1x16x128xf32>
    %cst_10 = arith.constant 9.99999997E-7 : f32
    %30 = vector.broadcast %cst_10 : f32 to vector<1x16x128xf32>
    %31 = arith.mulf %30, %2 : vector<1x16x128xf32>
    %32 = arith.addf %0, %31 : vector<1x16x128xf32>
    %33 = tpu.reciprocal %32 {approx = true} : vector<1x16x128xf32> -> vector<1x16x128xf32>
    %34 = arith.mulf %32, %33 : vector<1x16x128xf32>
    %cst_11 = arith.constant 2.000000e+00 : f32
    %35 = vector.broadcast %cst_11 : f32 to vector<1x16x128xf32>
    %36 = arith.subf %35, %34 : vector<1x16x128xf32>
    %37 = arith.mulf %33, %36 : vector<1x16x128xf32>
    %38 = arith.mulf %2, %37 : vector<1x16x128xf32>
    %c127_i32_12 = arith.constant 127 : i32
    %39 = tpu.dynamic_rotate %0 by %c127_i32_12 dim 2 : vector<1x16x128xf32>, i32 -> vector<1x16x128xf32>
    %40 = arith.mulf %39, %8 : vector<1x16x128xf32>
    %c1_i32 = arith.constant 1 : i32
    %41 = tpu.dynamic_rotate %0 by %c1_i32 dim 2 : vector<1x16x128xf32>, i32 -> vector<1x16x128xf32>
    %42 = arith.mulf %41, %12 : vector<1x16x128xf32>
    %43 = arith.subf %40, %42 : vector<1x16x128xf32>
    %cst_13 = arith.constant -5.000000e-01 : f32
    %44 = vector.broadcast %cst_13 : f32 to vector<1x16x128xf32>
    %45 = arith.mulf %43, %44 : vector<1x16x128xf32>
    %46 = arith.mulf %45, %29 : vector<1x16x128xf32>
    %c15_i32_14 = arith.constant 15 : i32
    %47 = tpu.dynamic_rotate %0 by %c15_i32_14 dim 1 : vector<1x16x128xf32>, i32 -> vector<1x16x128xf32>
    %48 = arith.mulf %47, %16 : vector<1x16x128xf32>
    %c1_i32_15 = arith.constant 1 : i32
    %49 = tpu.dynamic_rotate %0 by %c1_i32_15 dim 1 : vector<1x16x128xf32>, i32 -> vector<1x16x128xf32>
    %50 = arith.mulf %49, %20 : vector<1x16x128xf32>
    %51 = arith.subf %48, %50 : vector<1x16x128xf32>
    %cst_16 = arith.constant -5.000000e-01 : f32
    %52 = vector.broadcast %cst_16 : f32 to vector<1x16x128xf32>
    %53 = arith.mulf %51, %52 : vector<1x16x128xf32>
    %54 = arith.mulf %53, %38 : vector<1x16x128xf32>
    %55 = arith.mulf %46, %46 : vector<1x16x128xf32>
    %56 = arith.mulf %54, %54 : vector<1x16x128xf32>
    %57 = arith.addf %55, %56 : vector<1x16x128xf32>
    %cst_17 = arith.constant 1.000000e+00 : f32
    %58 = vector.broadcast %cst_17 : f32 to vector<1x16x128xf32>
    %59 = arith.addf %57, %58 : vector<1x16x128xf32>
    %60 = math.rsqrt %59 : vector<1x16x128xf32>
    %cst_18 = arith.constant 5.000000e-01 : f32
    %61 = vector.broadcast %cst_18 : f32 to vector<1x16x128xf32>
    %62 = arith.mulf %61, %59 : vector<1x16x128xf32>
    %63 = arith.mulf %62, %60 : vector<1x16x128xf32>
    %64 = arith.mulf %63, %60 : vector<1x16x128xf32>
    %cst_19 = arith.constant 1.500000e+00 : f32
    %65 = vector.broadcast %cst_19 : f32 to vector<1x16x128xf32>
    %66 = arith.subf %65, %64 : vector<1x16x128xf32>
    %67 = arith.mulf %60, %66 : vector<1x16x128xf32>
    %c0_20 = arith.constant 0 : index
    %c2 = arith.constant 2 : index
    %c0_21 = arith.constant 0 : index
    %c0_22 = arith.constant 0 : index
    %68 = vector.load %arg4[%c0_20, %c2, %c0_21, %c0_22] : memref<1x3x16x128xf32, #tpu.memory_space<vmem>>, vector<1x1x16x128xf32>
    %69 = vector.shape_cast %68 : vector<1x1x16x128xf32> to vector<1x16x128xf32>
    %70 = vector.shape_cast %67 : vector<1x16x128xf32> to vector<1x1x16x128xf32>
    tpu.vector_store %arg4[%c0_20, %c2, %c0_21, %c0_22], %70 {strides = array<i32>} : memref<1x3x16x128xf32, #tpu.memory_space<vmem>>, vector<1x1x16x128xf32>,
    %71 = arith.mulf %46, %67 : vector<1x16x128xf32>
    %72 = arith.mulf %54, %67 : vector<1x16x128xf32>
    %c0_23 = arith.constant 0 : index
    %c0_24 = arith.constant 0 : index
    %c0_25 = arith.constant 0 : index
    %c0_26 = arith.constant 0 : index
    %73 = vector.load %arg4[%c0_23, %c0_24, %c0_25, %c0_26] : memref<1x3x16x128xf32, #tpu.memory_space<vmem>>, vector<1x1x16x128xf32>
    %74 = vector.shape_cast %73 : vector<1x1x16x128xf32> to vector<1x16x128xf32>
    %75 = vector.shape_cast %71 : vector<1x16x128xf32> to vector<1x1x16x128xf32>
    tpu.vector_store %arg4[%c0_23, %c0_24, %c0_25, %c0_26], %75 {strides = array<i32>} : memref<1x3x16x128xf32, #tpu.memory_space<vmem>>, vector<1x1x16x128xf32>,
    %c0_27 = arith.constant 0 : index
    %c1 = arith.constant 1 : index
    %c0_28 = arith.constant 0 : index
    %c0_29 = arith.constant 0 : index
    %76 = vector.load %arg4[%c0_27, %c1, %c0_28, %c0_29] : memref<1x3x16x128xf32, #tpu.memory_space<vmem>>, vector<1x1x16x128xf32>
    %77 = vector.shape_cast %76 : vector<1x1x16x128xf32> to vector<1x16x128xf32>
    %78 = vector.shape_cast %72 : vector<1x16x128xf32> to vector<1x1x16x128xf32>
    tpu.vector_store %arg4[%c0_27, %c1, %c0_28, %c0_29], %78 {strides = array<i32>} : memref<1x3x16x128xf32, #tpu.memory_space<vmem>>, vector<1x1x16x128xf32>,
    %c127_i32_30 = arith.constant 127 : i32
    %79 = tpu.dynamic_rotate %71 by %c127_i32_30 dim 2 : vector<1x16x128xf32>, i32 -> vector<1x16x128xf32>
    %80 = arith.mulf %79, %8 : vector<1x16x128xf32>
    %c1_i32_31 = arith.constant 1 : i32
    %81 = tpu.dynamic_rotate %71 by %c1_i32_31 dim 2 : vector<1x16x128xf32>, i32 -> vector<1x16x128xf32>
    %82 = arith.mulf %81, %12 : vector<1x16x128xf32>
    %83 = arith.subf %80, %82 : vector<1x16x128xf32>
    %c15_i32_32 = arith.constant 15 : i32
    %84 = tpu.dynamic_rotate %72 by %c15_i32_32 dim 1 : vector<1x16x128xf32>, i32 -> vector<1x16x128xf32>
    %85 = arith.mulf %84, %16 : vector<1x16x128xf32>
    %c1_i32_33 = arith.constant 1 : i32
    %86 = tpu.dynamic_rotate %72 by %c1_i32_33 dim 1 : vector<1x16x128xf32>, i32 -> vector<1x16x128xf32>
    %87 = arith.mulf %86, %20 : vector<1x16x128xf32>
    %88 = arith.subf %85, %87 : vector<1x16x128xf32>
    %89 = arith.addf %83, %88 : vector<1x16x128xf32>
    %cst_34 = arith.constant 2.500000e-01 : f32
    %90 = vector.broadcast %cst_34 : f32 to vector<1x16x128xf32>
    %91 = arith.mulf %89, %90 : vector<1x16x128xf32>
    %c1_i32_35 = arith.constant 1 : i32
    %92 = tpu.dynamic_rotate %91 by %c1_i32_35 dim 2 : vector<1x16x128xf32>, i32 -> vector<1x16x128xf32>
    %93 = arith.mulf %92, %12 : vector<1x16x128xf32>
    %94 = arith.addf %93, %91 : vector<1x16x128xf32>
    %c127_i32_36 = arith.constant 127 : i32
    %95 = tpu.dynamic_rotate %91 by %c127_i32_36 dim 2 : vector<1x16x128xf32>, i32 -> vector<1x16x128xf32>
    %96 = arith.mulf %95, %8 : vector<1x16x128xf32>
    %97 = arith.addf %94, %96 : vector<1x16x128xf32>
    %c1_i32_37 = arith.constant 1 : i32
    %98 = tpu.dynamic_rotate %97 by %c1_i32_37 dim 1 : vector<1x16x128xf32>, i32 -> vector<1x16x128xf32>
    %99 = arith.mulf %98, %20 : vector<1x16x128xf32>
    %100 = arith.addf %99, %97 : vector<1x16x128xf32>
    %c15_i32_38 = arith.constant 15 : i32
    %101 = tpu.dynamic_rotate %97 by %c15_i32_38 dim 1 : vector<1x16x128xf32>, i32 -> vector<1x16x128xf32>
    %102 = arith.mulf %101, %16 : vector<1x16x128xf32>
    %103 = arith.addf %100, %102 : vector<1x16x128xf32>
    %cst_39 = arith.constant 0.111111112 : f32
    %104 = vector.broadcast %cst_39 : f32 to vector<1x16x128xf32>
    %105 = arith.mulf %103, %104 : vector<1x16x128xf32>
    %106 = math.absf %105 : vector<1x16x128xf32>
    %c0_40 = arith.constant 0 : index
    %c0_41 = arith.constant 0 : index
    %c0_42 = arith.constant 0 : index
    %107 = vector.load %arg5[%c0_40, %c0_41, %c0_42] : memref<1x16x128xf32, #tpu.memory_space<vmem>>, vector<1x16x128xf32>
    tpu.vector_store %arg5[%c0_40, %c0_41, %c0_42], %106 {strides = array<i32>} : memref<1x16x128xf32, #tpu.memory_space<vmem>>, vector<1x16x128xf32>,
    return
  }
  func.func @transform_0(%arg0: i32) -> (i32, i32, i32) {
    %c0_i32 = arith.constant 0 : i32
    %c0_i32_0 = arith.constant 0 : i32
    %c0_i32_1 = arith.constant 0 : i32
    return %arg0, %c0_i32, %c0_i32_0 : i32, i32, i32
  }
  func.func @transform_1(%arg0: i32) -> (i32, i32, i32) {
    %c0_i32 = arith.constant 0 : i32
    %c0_i32_0 = arith.constant 0 : i32
    %c0_i32_1 = arith.constant 0 : i32
    return %arg0, %c0_i32, %c0_i32_0 : i32, i32, i32
  }
  func.func @transform_2(%arg0: i32) -> (i32, i32, i32) {
    %c0_i32 = arith.constant 0 : i32
    %c0_i32_0 = arith.constant 0 : i32
    %c0_i32_1 = arith.constant 0 : i32
    return %arg0, %c0_i32, %c0_i32_0 : i32, i32, i32
  }
  func.func @transform_3(%arg0: i32) -> (i32, i32, i32, i32) {
    %c0_i32 = arith.constant 0 : i32
    %c0_i32_0 = arith.constant 0 : i32
    %c0_i32_1 = arith.constant 0 : i32
    %c0_i32_2 = arith.constant 0 : i32
    return %arg0, %c0_i32, %c0_i32_0, %c0_i32_1 : i32, i32, i32, i32
  }
  func.func @transform_4(%arg0: i32) -> (i32, i32, i32) {
    %c0_i32 = arith.constant 0 : i32
    %c0_i32_0 = arith.constant 0 : i32
    %c0_i32_1 = arith.constant 0 : i32
    return %arg0, %c0_i32, %c0_i32_0 : i32, i32, i32
  }
}

</mosaic_0001>

<bundles_post_ra>
// kernel: tpu_custom_call.1
= control target key start
LH: loop header
LB: loop body
LE: loop exit
PB: predicated region body
PF: predicated region fallthrough
CT: control target
= control target key end

     0   :  { %s1423_s0 = inlined_call_operand.hbm [shape: f32[2,16,128], index: 0, kind: input, shape index: {}]   ;;  %s1424_s1 = inlined_call_operand.hbm [shape: f32[2,16,128], index: 1, kind: input, shape index: {}]   ;;  %s1425_s2 = inlined_call_operand.hbm [shape: f32[2,16,128], index: 2, kind: input, shape index: {}]   ;;  %s1426_s3 = inlined_call_operand.hbm [shape: f32[2,3,16,128], index: 3, kind: output, shape index: {0}]   ;;  %s1427_s4 = inlined_call_operand.hbm [shape: f32[2,16,128], index: 4, kind: output, shape index: {1}]  }
   0x1   :  { %1434 = sst [smem:[#allocation15_spill]] %s1423_s0 }
   0x2   :  { %1435 = sst [smem:[#allocation16_spill]] %s1424_s1 }
   0x3   :  { %10 = vsyncpa [#allocation3], 0 }
   0x4   :  { %12 = vsyncpa [#allocation3 + $0x1], 0 }
   0x5   :  { %13 = vsyncpa [#allocation6], 0 }
   0x6   :  { %15 = vsyncpa [#allocation6 + $0x1], 0 }
   0x7   :  { %16 = vsyncpa [#allocation4], 0 }
   0x8   :  { %18 = vsyncpa [#allocation4 + $0x1], 0 }
   0x9   :  { %19 = vsyncpa [#allocation10], 0 }
   0xa   :  { %21 = vsyncpa [#allocation10 + $0x1], 0  ;;  %s1032_s15 = smov 0   ;;  %s1034_s16 = smov 0  }
   0xb   :  { %s1036_s17 = smov 0   ;;  %s1038_s18 = smov 0  }
   0xc LB: > { %s1053_s19 = sadd.s32 4294967295, %s993_s18   ;;  %s684_s20 = sadd.s32 4294967294, %s993_s18   ;;  %s993_s18 = sphi %s1038_s18, %s1455_s18   ;;  %s989_s17 = sphi %s1036_s17, %s1454_s17   ;;  %s985_s16 = sphi %s1034_s16, %s1453_s16   ;;  %s981_s15 = sphi %s1032_s15, %s1452_s15  }
   0xd   : > { %s1057_s21 = sadd.s32 1, %s993_s18   ;;  %s34_s22 = sadd.s32 1, %s989_s17 }
   0xe   : > { %s31_s23 = ssub.s32 %s993_s18, %s1057_s21  ;;  %p41_p0 = scmp.ne.s32.totalorder %s989_s17, %s985_s16 }
   0xf   : > { %p32_p1 = scmp.eq.s32.totalorder %s31_s23, 0  ;;  %p42_p2 = scmp.eq.s32.totalorder %s993_s18, 0 }
  0x10   : > { %p47_p3 = scmp.ne.s32.totalorder %s985_s16, %s981_s15  ;;  %p48_p4 = scmp.eq.s32.totalorder %s1053_s19, 0 }
  0x11   : > { %s1069_s24 = scalar_select %p32_p1, %s989_s17, %s34_s22  }
  0x12   : > { %p43_p5 = por %p42_p2, %p41_p0  ;;  %p1071_p6 = por %p48_p4, %p47_p3 }
  0x13   : > { %p123_p7 = scmp.eq.s32.totalorder %s1053_s19, 1  ;;  %p129_p8 = scmp.eq.s32.totalorder %s684_s20, 1 }
  0x14   : > { %s1436_s25 = scalar_select %p1071_p6, 1, 0 }
  0x15   : > { %p748_p10 = scmp.lt.s32.totalorder %s993_s18, 2  ;;  %p1078_p11 = por %p123_p7, %p41_p0 }
  0x16   : > { %p1082_p12 = por %p129_p8, %p47_p3  ;;  %s175_s28 = sand.u32 1, %s989_s17  }
  0x17   : > { %s1437_s26 = scalar_select %p1078_p11, 1, 0 }
  0x18   : > { %s1438_s27 = scalar_select %p1082_p12, 1, 0 }
  0x19   : > { %s1088_s29 = sshll.u32 %s993_s18, 8  ;;  %s1092_s30 = sshll.u32 %s175_s28, 4 }
  0x1a   : > { %p1094_p13 = pnand %p748_p10, %p43_p5  ;;  %s196_s6 = sand.u32 1, %s993_s18  }
  0x1b   : > { %s1440_s1 = sld [smem:[#allocation16_spill]]  ;;  %s200_s10 = scalar_lea.vmem [#allocation5], %s1092_s30 }
  0x1c   : > { %s207_s11 = sshll.u32 %s200_s10, 4  ;;  %s1109_s12 = scalar_lea.sflag [#allocation6], %s196_s6  ;;  %s1106_s11 = int_to_ptr.vmem [resolvable:$true] %s207_s11 }
  0x1d   : > { %p1115_p2 = pneg %p1094_p13 }
  0x21   : > { %s1103_s9 = scalar_lea.hbm %s1440_s1, %s1088_s29  ;;  %s806_s23 = scalar_lea.hbm %s1440_s1, 512 }
  0x22   : > { %s801_s13 = scalar_lea.hbm %s1103_s9, 256  ;;  %p807_p5 = scmp.lt.u32.totalorder %s1103_s9, %s1440_s1 }
  0x23   : > { %p802_p1 = scmp.ne.s32.totalorder %s1103_s9, %s801_s13  ;;  %p808_p7 = scmp.lt.u32.totalorder %s806_s23, %s801_s13 }
  0x24   : > { %p810_p10 = scmp.lt.u32.totalorder %s801_s13, %s1103_s9 }
  0x25   : > { %p804_p3 = pnand %p1115_p2, %p802_p1  ;;  %p809_p8 = por %p808_p7, %p807_p5 }
  0x27   : > { %p805_p4 = pneg %p804_p3  ;;  %p811_p9 = por %p810_p10, %p809_p8 }
  0x29   : > { %p812_p0 = pnand %p811_p9, %p805_p4 }
  0x2b   : > { %815 = shalt.err (!%p812_p0)
}
  0x2c   : > { %s816_s6 = scalar_lea.vmem %s1106_s11, 256  ;;  %s995_s10 = smov [#allocation5]  }
  0x2d   : > { %p817_p1 = scmp.ne.s32.totalorder %s1106_s11, %s816_s6  ;;  %s821_s20 = sshll.u32 %s995_s10, 4  ;;  %s822_s20 = int_to_ptr.vmem [resolvable:$false] %s821_s20 }
  0x2e   : > { %s823_s22 = scalar_lea.vmem %s822_s20, 512  ;;  %p824_p11 = scmp.lt.s32.totalorder %s1106_s11, %s822_s20 }
  0x2f   : > { %p819_p3 = pnand %p817_p1, %p1115_p2  ;;  %p825_p6 = scmp.lt.s32.totalorder %s823_s22, %s816_s6 }
  0x31   : > { %p820_p12 = pneg %p819_p3  ;;  %p826_p5 = por %p825_p6, %p824_p11 }
  0x33   : > { %p827_p7 = pnand %p826_p5, %p820_p12 }
  0x35   : > { %830 = shalt.err (!%p827_p7)
}
  0x36   : > { %s1430_s13 = smov 128   ;;  %s1432_s23 = smov 8  }
  0x37   : > { %737 = dma.hbm_to_vmem [thread:$0]  (!%p1094_p13), %s1103_s9, 256, %s1106_s11, %s1109_s12, %s1430_s13, %s1430_s13, %s1432_s23  }
  0x38   : > { %p236_p6 = scmp.lt.s32.totalorder %s993_s18, 3  ;;  %s1442_s0 = sld [smem:[#allocation15_spill]] }
  0x39   : > { %p1443_p9 = scmp.ge.s32.totalorder %s993_s18, 1  ;;  %s179_s20 = scalar_lea.vmem [#allocation2], %s1092_s30 }
  0x3a   : > { %s186_s22 = sshll.u32 %s179_s20, 4  ;;  %s1160_s9 = scalar_lea.sflag [#allocation3], %s175_s28  ;;  %s1156_s22 = int_to_ptr.vmem [resolvable:$true] %s186_s22 }
  0x3b   : > { %p1151_p11 = pnand %p1443_p9, %p236_p6 }
  0x3d   : > { %s1444_s10 = scalar_select %p1151_p11, 1, 0 }
  0x3e   : > { %s1147_s6 = scalar_lea.hbm %s1442_s0, %s1088_s29  ;;  %s836_s13 = scalar_lea.hbm %s1442_s0, 512 }
  0x3f   : > { %s831_s11 = scalar_lea.hbm %s1147_s6, 256  ;;  %p837_p8 = scmp.lt.u32.totalorder %s1147_s6, %s1442_s0 }
  0x40   : > { %p832_p12 = scmp.ne.s32.totalorder %s1147_s6, %s831_s11  ;;  %p838_p10 = scmp.lt.u32.totalorder %s836_s13, %s831_s11 }
  0x41   : > { %p840_p3 = scmp.lt.u32.totalorder %s831_s11, %s1147_s6 }
  0x42   : > { %p834_p0 = pnand %p832_p12, %p1115_p2  ;;  %p839_p1 = por %p838_p10, %p837_p8 }
  0x44   : > { %p835_p4 = pneg %p834_p0  ;;  %p841_p5 = por %p840_p3, %p839_p1 }
  0x46   : > { %p842_p7 = pnand %p841_p5, %p835_p4 }
  0x48   : > { %845 = shalt.err (!%p842_p7)
}
  0x49   : > { %s846_s28 = scalar_lea.vmem %s1156_s22, 256  ;;  %s998_s20 = smov [#allocation2]  }
  0x4a   : > { %p847_p6 = scmp.ne.s32.totalorder %s1156_s22, %s846_s28  ;;  %s851_s7 = sshll.u32 %s998_s20, 4  ;;  %s852_s7 = int_to_ptr.vmem [resolvable:$false] %s851_s7 }
  0x4b   : > { %s853_s1 = scalar_lea.vmem %s852_s7, 512  ;;  %p854_p0 = scmp.lt.s32.totalorder %s1156_s22, %s852_s7 }
  0x4c   : > { %p849_p9 = pnand %p847_p6, %p1115_p2  ;;  %p855_p11 = scmp.lt.s32.totalorder %s853_s1, %s846_s28 }
  0x4e   : > { %p850_p12 = pneg %p849_p9  ;;  %p856_p8 = por %p855_p11, %p854_p0 }
  0x50   : > { %p857_p10 = pnand %p856_p8, %p850_p12 }
  0x52   : > { %860 = shalt.err (!%p857_p10)
}
  0x53   : > { %s1445_s13 = smov 8   ;;  %s1446_s23 = smov 128  }
  0x54   : > { %734 = dma.hbm_to_vmem [thread:$0]  (!%p1094_p13), %s1147_s6, 256, %s1156_s22, %s1160_s9, %s1446_s23, %s1446_s23, %s1445_s13  }
  0x55   : > { %s1191_s20 = scalar_lea.hbm %s1425_s2, %s1088_s29  ;;  %s221_s28 = scalar_lea.vmem [#allocation7], %s1092_s30 }
  0x56   : > { %s228_s7 = sshll.u32 %s221_s28, 4  ;;  %s861_s1 = scalar_lea.hbm %s1191_s20, 256  ;;  %s1194_s7 = int_to_ptr.vmem [resolvable:$true] %s228_s7 }
  0x57   : > { %p862_p11 = scmp.ne.s32.totalorder %s1191_s20, %s861_s1  ;;  %s866_s22 = scalar_lea.hbm %s1425_s2, 512 }
  0x58   : > { %p867_p3 = scmp.lt.u32.totalorder %s1191_s20, %s1425_s2  ;;  %p868_p5 = scmp.lt.u32.totalorder %s866_s22, %s861_s1 }
  0x59   : > { %p864_p4 = pnand %p862_p11, %p1115_p2  ;;  %p870_p6 = scmp.lt.u32.totalorder %s861_s1, %s1191_s20 }
  0x5a   : > { %p869_p7 = por %p868_p5, %p867_p3 }
  0x5b   : > { %p865_p1 = pneg %p864_p4 }
  0x5c   : > { %p871_p9 = por %p870_p6, %p869_p7 }
  0x5e   : > { %p872_p12 = pnand %p871_p9, %p865_p1 }
  0x60   : > { %875 = shalt.err (!%p872_p12)
}
  0x61   : > { %s876_s30 = scalar_lea.vmem %s1194_s7, 256  ;;  %s999_s0 = smov [#allocation7]  }
  0x62   : > { %p877_p0 = scmp.ne.s32.totalorder %s1194_s7, %s876_s30  ;;  %s881_s11 = sshll.u32 %s999_s0, 4  ;;  %s882_s11 = int_to_ptr.vmem [resolvable:$false] %s881_s11 }
  0x63   : > { %s883_s8 = scalar_lea.vmem %s882_s11, 512  ;;  %p884_p11 = scmp.lt.s32.totalorder %s1194_s7, %s882_s11 }
  0x64   : > { %p879_p8 = pnand %p877_p0, %p1115_p2  ;;  %p885_p4 = scmp.lt.s32.totalorder %s883_s8, %s876_s30 }
  0x66   : > { %p880_p10 = pneg %p879_p8  ;;  %p886_p3 = por %p885_p4, %p884_p11 }
  0x68   : > { %p887_p5 = pnand %p886_p3, %p880_p10 }
  0x6a   : > { %890 = shalt.err (!%p887_p5)
}
  0x6b   : > { %740 = dma.hbm_to_vmem [thread:$0]  (!%p1094_p13), %s1191_s20, 256, %s1194_s7, %s1109_s12, %s1446_s23, %s1446_s23, %s1445_s13  }
  0x6c   : > { %p1447_p2 = scmp.ne.s32.totalorder %s1444_s10, 0 }
  0x6d   : > { %s1224_s14 = sand.u32 (!%p1447_p2), 1, %s985_s16   ;;  %p1448_p1 = scmp.ne.s32.totalorder (!%p1447_p2), %s1436_s25, 0 }
  0x6e   : > { %240 = sbr.rel (%p1447_p2) target bundleno = 553 (0x229), region = 32  ;;  %s1227_s28 = sshll.u32 (!%p1447_p2), %s1224_s14, 4 }
  0x6f   : > { %s243_s5 = scalar_lea.sflag (!%p1447_p2), [#allocation3], %s1224_s14  ;;  %s246_s1 = scalar_lea.vmem (!%p1447_p2), [#allocation2], %s1227_s28 }
  0x75   : > { %964 = dma.done.wait (%p1448_p1), %s243_s5, 256  }
  0x76   : > { %966 = vsyncadd (%p1448_p1), %s243_s5, 4294967040  ;;  %s251_s12 = sand.u32 1, %s1053_s19   ;;  %s255_s13 = scalar_lea.vmem [#allocation5], %s1227_s28 }
  0x77   : > { %s252_s10 = scalar_lea.sflag [#allocation6], %s251_s12 }
  0x78   : > { %968 = dma.done.wait (%p1448_p1), %s252_s10, 512  }
  0x79   : > { %970 = vsyncadd (%p1448_p1), %s252_s10, 4294966784  ;;  %v310_v0 = vlaneseq  ;;  %v304_v3 = vld [vmem:[%s246_s1] sm:$0xff]  ;;  %v305_v4 = vld [vmem:[%s246_s1 + $0x8] sm:$0xff]  ;;  %v1000_v5 = vmov 0.0   ;;  %s1001_s25 = smov 1   ;;  %s1002_s23 = smov 127  }
  0x7a   : > { %367 = vrot.lane.b32.xlu1 %v304_v3, %s1001_s25  ;;  %v379_v7 = vrot.slane %v304_v3, 1  ;;  %v386_v8 = vrot.slane %v304_v3, 7  ;;  %361 = vrot.lane.b32.xlu0 %v304_v3, %s1002_s23  ;;  %v380_v9 = vrot.slane %v305_v4, 1  ;;  %v387_v10 = vrot.slane %v305_v4, 7  ;;  %s264_s20 = scalar_lea.vmem [#allocation7], %s1227_s28  ;;  %v306_v40 = vld [vmem:[%s255_s13] sm:$0xff] }
  0x7b   : > { %v1241_v1 = vshrl.u32 %v310_v0, 7  ;;  %v308_v11 = vld [vmem:[%s264_s20] sm:$0xff]  ;;  %v309_v14 = vld [vmem:[%s264_s20 + $0x8] sm:$0xff]  ;;  %v333_v41 = vmul.f32 1e-06, %v306_v40  ;;  %v311_v47 = vand.u32 127, %v310_v0 }
  0x7c   : > { %v347_v13 = vmul.f32 1e-06, %v308_v11  ;;  %v348_v17 = vmul.f32 1e-06, %v309_v14  ;;  %v307_v42 = vld [vmem:[%s255_s13 + $0x8] sm:$0xff]  ;;  %s719_s7 = smul.u32 48, %s1224_s14 }
  0x7d   : > { %v314_v2 = vadd.s32 8, %v1241_v1  ;;  %vm327_vm0 = vcmp.gt.s32.totalorder %v1241_v1, 0  ;;  %vm381_vm2 = vcmp.lt.s32.totalorder %v1241_v1, 7  ;;  %vm388_vm3 = vcmp.lt.s32.totalorder %v1241_v1, 1  ;;  %s720_s9 = smul.u32 768, %s1053_s19  ;;  %s502_s11 = scalar_lea.sflag [#allocation4], %s1224_s14 }
  0x7e   : > { %v1246_v6 = vsel %vm327_vm0, 1.0, %v1000_v5  ;;  %v382_v15 = vsel %vm381_vm2, %v379_v7, %v380_v9  ;;  %v390_v16 = vsel %vm388_vm3, %v387_v10, %v386_v8  ;;  %v349_v18 = vadd.f32 %v347_v13, %v304_v3  ;;  %369 = vrot.lane.b32.xlu1 %v305_v4, %s1001_s25  ;;  %363 = vrot.lane.b32.xlu0 %v305_v4, %s1002_s23  ;;  %s1288_s6 = scalar_lea.vmem [#allocation8], %s719_s7  ;;  %p1449_p7 = scmp.ne.s32.totalorder %s1437_s26, 0 }
  0x7f   : > { %vm322_vm1 = vcmp.lt.s32.totalorder %v314_v2, 15  ;;  %v391_v19 = vmul.f32 %v1246_v6, %v390_v16  ;;  %v383_v20 = vsel %vm381_vm2, %v380_v9, %v379_v7  ;;  %v350_v21 = vadd.f32 %v348_v17, %v305_v4  ;;  %s520_s22 = sshll.u32 %s1288_s6, 4  ;;  %s1326_s0 = scalar_lea.hbm %s1426_s3, %s720_s9  ;;  %s1321_s22 = int_to_ptr.vmem [resolvable:$true] %s520_s22 }
  0x80   : > { %v1255_v12 = vsel %vm322_vm1, 1.0, %v1000_v5  ;;  %v389_v24 = vsel %vm388_vm3, %v386_v8, %v387_v10  ;;  %789 = vrcp.f32 %v349_v18  ;;  %v335_v43 = vadd.f32 %v333_v41, %v304_v3  ;;  %s891_s8 = scalar_lea.vmem %s1321_s22, 768  ;;  %s1003_s5 = smov [#allocation8]  }
  0x81   : > { %v385_v22 = vmul.f32 %v1255_v12, %v383_v20  ;;  %v393_v23 = vsub.f32 %v382_v15, %v391_v19  ;;  %791 = vrcp.f32 %v350_v21  ;;  %v334_v44 = vmul.f32 1e-06, %v307_v42  ;;  %p892_p13 = scmp.ne.s32.totalorder %s1321_s22, %s891_s8  ;;  %s895_s1 = sshll.u32 %s1003_s5, 4  ;;  %s896_s1 = int_to_ptr.vmem [resolvable:$false] %s895_s1 }
  0x82   : > { %793 = vrcp.f32 %v335_v43  ;;  %vm318_vm4 = vcmp.gt.s32.totalorder %v311_v47, 0  ;;  %vm315_vm5 = vcmp.lt.s32.totalorder %v311_v47, 127  ;;  %s897_s12 = scalar_lea.vmem %s896_s1, 1536  ;;  %p898_p12 = scmp.lt.s32.totalorder %s1321_s22, %s896_s1 }
  0x83   : > { %v394_v25 = vsub.f32 %v385_v22, %v389_v24  ;;  %v395_v32 = vmul.f32 -0.5, %v393_v23  ;;  %v336_v45 = vadd.f32 %v334_v44, %v305_v4  ;;  %v1276_v52 = vsel %vm318_vm4, 1.0, %v1000_v5  ;;  %p893_p6 = pnand %p892_p13, %p1449_p7  ;;  %p899_p0 = scmp.lt.s32.totalorder %s897_s12, %s891_s8 }
  0x84   : > { %v1279_v53 = vsel %vm315_vm5, 1.0, %v1000_v5 }
  0x85   : > { %v396_v36 = vmul.f32 -0.5, %v394_v25  ;;  %795 = vrcp.f32 %v336_v45  ;;  %p894_p9 = pneg %p893_p6  ;;  %p900_p8 = por %p899_p0, %p898_p12 }
  0x87   : > { %p901_p10 = pnand %p900_p8, %p894_p9 }
  0x8a   : > { %v790_v26 = vpop.eup %789 }
  0x8b   : > { %v353_v27 = vmul.f32 %v790_v26, %v349_v18  ;;  %v792_v28 = vpop.eup %791 }
  0x8c   : > { %v354_v30 = vmul.f32 %v792_v28, %v350_v21  ;;  %v794_v46 = vpop.eup %793 }
  0x8d   : > { %v355_v29 = vsub.f32 2.0, %v353_v27  ;;  %v339_v48 = vmul.f32 %v794_v46, %v335_v43 }
  0x8e   : > { %v356_v33 = vsub.f32 2.0, %v354_v30 }
  0x8f   : > { %v357_v31 = vmul.f32 %v790_v26, %v355_v29  ;;  %v796_v49 = vpop.eup %795  ;;  %v341_v50 = vsub.f32 2.0, %v339_v48 }
  0x90   : > { %v358_v35 = vmul.f32 %v792_v28, %v356_v33  ;;  %v340_v51 = vmul.f32 %v796_v49, %v336_v45 }
  0x91   : > { %v359_v34 = vmul.f32 %v357_v31, %v308_v11  ;;  %v343_v54 = vmul.f32 %v794_v46, %v341_v50 }
  0x92   : > { %v360_v38 = vmul.f32 %v358_v35, %v309_v14  ;;  %v342_v55 = vsub.f32 2.0, %v340_v51 }
  0x93   : > { %v397_v37 = vmul.f32 %v395_v32, %v359_v34  ;;  %v345_v60 = vmul.f32 %v343_v54, %v306_v40 }
  0x94   : > { %v1269_v39 = vmul.f32 %v396_v36, %v360_v38  ;;  %v344_v62 = vmul.f32 %v796_v49, %v342_v55 }
  0x95   : > { %v401_v7 = vmul.f32 %v397_v37, %v397_v37 }
  0x96   : > { %v346_v8 = vmul.f32 %v344_v62, %v307_v42  ;;  %v402_v15 = vmul.f32 %v1269_v39, %v1269_v39 }
  0xec   : > { %v368_v56 = vpop.permute.xlu1 %367  ;;  %v362_v57 = vpop.permute.xlu0 %361 }
  0xed   : > { %v371_v58 = vmul.f32 %v1276_v52, %v368_v56  ;;  %v365_v59 = vmul.f32 %v1279_v53, %v362_v57 }
  0xef   : > { %v373_v61 = vsub.f32 %v365_v59, %v371_v58 }
  0xf0   : > { %v370_v63 = vpop.permute.xlu1 %369  ;;  %v364_v0 = vpop.permute.xlu0 %363 }
  0xf1   : > { %v375_v2 = vmul.f32 -0.5, %v373_v61  ;;  %v372_v3 = vmul.f32 %v1276_v52, %v370_v63  ;;  %v366_v4 = vmul.f32 %v1279_v53, %v364_v0 }
  0xf3   : > { %v377_v5 = vmul.f32 %v375_v2, %v345_v60  ;;  %v374_v9 = vsub.f32 %v366_v4, %v372_v3 }
  0xf5   : > { %v399_v10 = vmul.f32 %v377_v5, %v377_v5  ;;  %v376_v11 = vmul.f32 -0.5, %v374_v9 }
  0xf7   : > { %v403_v13 = vadd.f32 %v401_v7, %v399_v10  ;;  %v378_v14 = vmul.f32 %v376_v11, %v346_v8 }
  0xf9   : > { %v405_v16 = vadd.f32 1.0, %v403_v13  ;;  %v400_v17 = vmul.f32 %v378_v14, %v378_v14 }
  0xfb   : > { %797 = vrsqrt.f32 %v405_v16  ;;  %v404_v18 = vadd.f32 %v402_v15, %v400_v17  ;;  %v409_v20 = vmul.f32 0.5, %v405_v16 }
  0xfd   : > { %v406_v19 = vadd.f32 1.0, %v404_v18 }
  0xff   : > { %799 = vrsqrt.f32 %v406_v19  ;;  %v410_v23 = vmul.f32 0.5, %v406_v19 }
 0x105   : > { %v798_v21 = vpop.eup %797 }
 0x106   : > { %v411_v22 = vmul.f32 %v798_v21, %v409_v20 }
 0x108   : > { %v413_v24 = vmul.f32 %v798_v21, %v411_v22 }
 0x109   : > { %v800_v25 = vpop.eup %799 }
 0x10a   : > { %v415_v26 = vsub.f32 1.5, %v413_v24  ;;  %v412_v27 = vmul.f32 %v800_v25, %v410_v23 }
 0x10c   : > { %v417_v28 = vmul.f32 %v798_v21, %v415_v26  ;;  %v414_v29 = vmul.f32 %v800_v25, %v412_v27 }
 0x10e   : > { %v422_v30 = vmul.f32 %v417_v28, %v377_v5  ;;  %v424_v31 = vmul.f32 %v417_v28, %v397_v37  ;;  %705 = vst [vmem:[%s1288_s6 + $0x20] sm:$0xff] %v417_v28  ;;  %v416_v32 = vsub.f32 1.5, %v414_v29 }
 0x110   : > { %707 = vst [vmem:[%s1288_s6 + $0x10] sm:$0xff] %v424_v31  ;;  %431 = vrot.lane.b32.xlu0 %v422_v30, %s1002_s23  ;;  %426 = vst [vmem:[%s1288_s6] sm:$0xff] %v422_v30  ;;  %v418_v33 = vmul.f32 %v800_v25, %v416_v32  ;;  %v445_v36 = vrot.slane %v424_v31, 1  ;;  %v451_v38 = vrot.slane %v424_v31, 7 }
 0x112   : > { %v423_v34 = vmul.f32 %v418_v33, %v378_v14  ;;  %v425_v35 = vmul.f32 %v418_v33, %v1269_v39  ;;  %706 = vst [vmem:[%s1288_s6 + $0x28] sm:$0xff] %v418_v33 }
 0x114   : > { %708 = vst [vmem:[%s1288_s6 + $0x18] sm:$0xff] %v425_v35  ;;  %433 = vrot.lane.b32.xlu1 %v423_v34, %s1002_s23  ;;  %427 = vst [vmem:[%s1288_s6 + $0x8] sm:$0xff] %v423_v34  ;;  %437 = vrot.lane.b32.xlu0 %v422_v30, %s1001_s25  ;;  %v446_v37 = vrot.slane %v425_v35, 1  ;;  %v452_v40 = vrot.slane %v425_v35, 7 }
 0x116   : > { %v447_v41 = vsel %vm381_vm2, %v445_v36, %v446_v37  ;;  %v454_v42 = vsel %vm388_vm3, %v452_v40, %v451_v38  ;;  %v448_v39 = vsel %vm381_vm2, %v446_v37, %v445_v36  ;;  %v453_v43 = vsel %vm388_vm3, %v451_v38, %v452_v40 }
 0x117   : > { %v455_v44 = vmul.f32 %v1246_v6, %v454_v42  ;;  %v450_v45 = vmul.f32 %v1255_v12, %v448_v39 }
 0x118   : > { %439 = vrot.lane.b32.xlu1 %v423_v34, %s1001_s25 }
 0x119   : > { %v457_v46 = vsub.f32 %v447_v41, %v455_v44  ;;  %v458_v47 = vsub.f32 %v450_v45, %v453_v43 }
 0x182   : > { %v432_v48 = vpop.permute.xlu0 %431 }
 0x183   : > { %v435_v51 = vmul.f32 %v1279_v53, %v432_v48 }
 0x186   : > { %v434_v49 = vpop.permute.xlu1 %433  ;;  %v438_v50 = vpop.permute.xlu0 %437 }
 0x187   : > { %v441_v54 = vmul.f32 %v1276_v52, %v438_v50  ;;  %v436_v57 = vmul.f32 %v1279_v53, %v434_v49 }
 0x189   : > { %v443_v55 = vsub.f32 %v435_v51, %v441_v54 }
 0x18a   : > { %v440_v56 = vpop.permute.xlu1 %439 }
 0x18b   : > { %v442_v58 = vmul.f32 %v1276_v52, %v440_v56  ;;  %v459_v59 = vadd.f32 %v457_v46, %v443_v55 }
 0x18d   : > { %v444_v60 = vsub.f32 %v436_v57, %v442_v58  ;;  %v461_v61 = vmul.f32 0.25, %v459_v59 }
 0x18f   : > { %463 = vrot.lane.b32.xlu0 %v461_v61, %s1001_s25  ;;  %v460_v62 = vadd.f32 %v458_v47, %v444_v60 }
 0x191   : > { %v462_v63 = vmul.f32 0.25, %v460_v62 }
 0x193   : > { %465 = vrot.lane.b32.xlu1 %v462_v63, %s1001_s25  ;;  %471 = vrot.lane.b32.xlu0 %v461_v61, %s1002_s23 }
 0x197   : > { %473 = vrot.lane.b32.xlu1 %v462_v63, %s1002_s23 }
 0x198   : > { %904 = shalt.err (!%p901_p10)
}
 0x199   : > { %s905_s10 = scalar_lea.hbm %s1326_s0, 768  ;;  %s909_s23 = scalar_lea.hbm %s1426_s3, 1536 }
 0x19a   : > { %p906_p11 = scmp.ne.s32.totalorder %s1326_s0, %s905_s10  ;;  %p910_p5 = scmp.lt.u32.totalorder %s1326_s0, %s1426_s3 }
 0x19b   : > { %p911_p2 = scmp.lt.u32.totalorder %s909_s23, %s905_s10  ;;  %p913_p13 = scmp.lt.u32.totalorder %s905_s10, %s1326_s0 }
 0x19c   : > { %p907_p4 = pnand %p906_p11, %p1449_p7 }
 0x19d   : > { %p912_p1 = por %p911_p2, %p910_p5 }
 0x19e   : > { %p908_p3 = pneg %p907_p4 }
 0x19f   : > { %p914_p6 = por %p913_p13, %p912_p1 }
 0x1a1   : > { %p915_p9 = pnand %p914_p6, %p908_p3 }
 0x1a3   : > { %918 = shalt.err (!%p915_p9)
}
 0x1a4   : > { %s1004_s6 = smov 128   ;;  %s1005_s9 = smov 8  }
 0x1a5   : > { %727 = dma.vmem_to_hbm [thread:$0]  (%p1449_p7), %s1321_s22, 768, %s1326_s0, %s502_s11, %s1004_s6, %s1004_s6, %s1005_s9  }
 0x1a6   : > { %s718_s22 = sshll.u32 %s1053_s19, 8  ;;  %s303_s29 = scalar_lea.vmem [#allocation9], %s1227_s28 }
 0x1a7   : > { %s536_s30 = sshll.u32 %s303_s29, 4  ;;  %s1374_s8 = scalar_lea.hbm %s1427_s4, %s718_s22  ;;  %s1376_s30 = int_to_ptr.vmem [resolvable:$true] %s536_s30 }
 0x1a8   : > { %s507_s5 = scalar_lea.sflag [#allocation10], %s1224_s14  ;;  %s919_s1 = scalar_lea.vmem %s1376_s30, 256 }
 0x1a9   : > { %p920_p12 = scmp.ne.s32.totalorder %s1376_s30, %s919_s1  ;;  %s1006_s19 = smov [#allocation9]  }
 0x1aa   : > { %s923_s28 = sshll.u32 %s1006_s19, 4  ;;  %s924_s28 = int_to_ptr.vmem [resolvable:$false] %s923_s28 }
 0x1ab   : > { %p921_p0 = pnand %p920_p12, %p1449_p7  ;;  %s925_s12 = scalar_lea.vmem %s924_s28, 512 }
 0x1ac   : > { %p926_p10 = scmp.lt.s32.totalorder %s1376_s30, %s924_s28  ;;  %p927_p11 = scmp.lt.s32.totalorder %s925_s12, %s919_s1 }
 0x1ad   : > { %p922_p8 = pneg %p921_p0 }
 0x1ae   : > { %p928_p4 = por %p927_p11, %p926_p10 }
 0x1b0   : > { %p929_p3 = pnand %p928_p4, %p922_p8 }
 0x201   : > { %v464_v0 = vpop.permute.xlu0 %463 }
 0x202   : > { %v467_v2 = vmul.f32 %v1276_v52, %v464_v0 }
 0x204   : > { %v469_v8 = vadd.f32 %v467_v2, %v461_v61 }
 0x205   : > { %v466_v3 = vpop.permute.xlu1 %465  ;;  %v472_v4 = vpop.permute.xlu0 %471 }
 0x206   : > { %v468_v5 = vmul.f32 %v1276_v52, %v466_v3  ;;  %v475_v7 = vmul.f32 %v1279_v53, %v472_v4 }
 0x208   : > { %v470_v10 = vadd.f32 %v468_v5, %v462_v63  ;;  %v477_v11 = vadd.f32 %v475_v7, %v469_v8 }
 0x209   : > { %v474_v9 = vpop.permute.xlu1 %473 }
 0x20a   : > { %v476_v13 = vmul.f32 %v1279_v53, %v474_v9  ;;  %v479_v15 = vrot.slane %v477_v11, 7  ;;  %v487_v16 = vrot.slane %v477_v11, 1 }
 0x20c   : > { %v478_v14 = vadd.f32 %v476_v13, %v470_v10 }
 0x20e   : > { %v480_v17 = vrot.slane %v478_v14, 7  ;;  %v488_v18 = vrot.slane %v478_v14, 1 }
 0x210   : > { %v481_v19 = vsel %vm388_vm3, %v479_v15, %v480_v17  ;;  %v482_v52 = vsel %vm388_vm3, %v480_v17, %v479_v15  ;;  %v490_v20 = vsel %vm381_vm2, %v488_v18, %v487_v16  ;;  %v489_v25 = vsel %vm381_vm2, %v487_v16, %v488_v18 }
 0x211   : > { %v483_v21 = vmul.f32 %v1246_v6, %v482_v52  ;;  %v486_v22 = vadd.f32 %v481_v19, %v478_v14  ;;  %v492_v53 = vmul.f32 %v1255_v12, %v490_v20 }
 0x213   : > { %v485_v23 = vadd.f32 %v483_v21, %v477_v11  ;;  %v494_v24 = vadd.f32 %v492_v53, %v486_v22 }
 0x215   : > { %v493_v26 = vadd.f32 %v489_v25, %v485_v23  ;;  %v496_v27 = vmul.f32 0.11111111, %v494_v24 }
 0x217   : > { %v495_v28 = vmul.f32 0.11111111, %v493_v26  ;;  %v498_v29 = vand.u32 2147483647, %v496_v27 }
 0x219   : > { %v497_v30 = vand.u32 2147483647, %v495_v28  ;;  %500 = vst [vmem:[%s303_s29 + $0x8] sm:$0xff] %v498_v29 }
 0x21b   : > { %499 = vst [vmem:[%s303_s29] sm:$0xff] %v497_v30 }
 0x21c   : > { %932 = shalt.err (!%p929_p3)
}
 0x21d   : > { %s933_s10 = scalar_lea.hbm %s1374_s8, 256  ;;  %s937_s23 = scalar_lea.hbm %s1427_s4, 512 }
 0x21e   : > { %p934_p5 = scmp.ne.s32.totalorder %s1374_s8, %s933_s10  ;;  %p938_p13 = scmp.lt.u32.totalorder %s1374_s8, %s1427_s4 }
 0x21f   : > { %p939_p6 = scmp.lt.u32.totalorder %s937_s23, %s933_s10  ;;  %p941_p12 = scmp.lt.u32.totalorder %s933_s10, %s1374_s8 }
 0x220   : > { %p935_p2 = pnand %p934_p5, %p1449_p7 }
 0x221   : > { %p940_p9 = por %p939_p6, %p938_p13 }
 0x222   : > { %p936_p1 = pneg %p935_p2 }
 0x223   : > { %p942_p0 = por %p941_p12, %p940_p9 }
 0x225   : > { %p943_p8 = pnand %p942_p0, %p936_p1 }
 0x227   : > { %946 = shalt.err (!%p943_p8)
}
 0x228   : > { %728 = dma.vmem_to_hbm [thread:$0]  (%p1449_p7), %s1376_s30, 256, %s1374_s8, %s507_s5, %s1004_s6, %s1004_s6, %s1005_s9  }
 0x229 PF: > { %s551_s22 = sand.u32 1, %s981_s15   ;;  %p1450_p10 = scmp.ne.s32.totalorder %s1438_s27, 0 }
 0x22a   : > { %p1451_p11 = scmp.ge.s32.totalorder %s993_s18, 2  ;;  %s552_s29 = scalar_lea.sflag [#allocation4], %s551_s22 }
 0x22c   : > { %p742_p4 = pnand %p1451_p11, %p1450_p10 }
 0x22e   : > { %972 = dma.done.wait (!%p742_p4), %s552_s29, 768  }
 0x22f   : > { %974 = vsyncadd (!%p742_p4), %s552_s29, 4294966528  ;;  %s561_s26 = scalar_lea.sflag [#allocation10], %s551_s22 }
 0x230   : > { %976 = dma.done.wait (!%p742_p4), %s561_s26, 256  }
 0x231   : > { %978 = vsyncadd (!%p742_p4), %s561_s26, 4294967040  ;;  %p24_p7 = scmp.ge.s32.totalorder %s1057_s21, 4   ;;  %s1452_s15 = smov %s985_s16 }
 0x232   : > { %s1453_s16 = smov %s989_s17  ;;  %s1454_s17 = smov %s1069_s24 }
 0x233   : > { %s1455_s18 = smov %s1057_s21  ;;  %26 = sbr.rel (!%p24_p7) target bundleno = 12 (0xc), region = 120 }
 0x23a   :  { %566 = vsyncpa [#allocation3], 1 }
 0x23b   :  { %568 = vsyncpa [#allocation3 + $0x1], 1 }
 0x23c   :  { %569 = vsyncpa [#allocation6], 1 }
 0x23d   :  { %571 = vsyncpa [#allocation6 + $0x1], 1 }
 0x23e   :  { %572 = vsyncpa [#allocation4], 1 }
 0x23f   :  { %574 = vsyncpa [#allocation4 + $0x1], 1 }
 0x240   :  { %575 = vsyncpa [#allocation10], 1 }
 0x241   :  { %577 = vsyncpa [#allocation10 + $0x1], 1 }

</bundles_post_ra>
